<compile_context>
chip_gen: v7x
topology: tpu7x:2x2x1
jax: 0.10.0
libtpu: 0.0.40
codegen_flags: <defaults>
</compile_context>

<pallas_src>
import functools

import jax
import jax.numpy as jnp
from jax.experimental import pallas as pl
from jax.experimental.pallas import tpu as pltpu


def _round_up(x, m):
    return ((x + m - 1) // m) * m


def _cdiv(a, b):
    return -(-a // b)


def _fused_mlp_kernel(x_ref, w1_ref, w2_ref, bias_ref, o_ref):
    """One batch tile per grid step; both matmuls + bias + ReLU fused in VMEM."""
    H = w1_ref.shape[1]
    D_out = o_ref.shape[1]

    bias = bias_ref[...]                 # (2, W) f32, resident
    b1 = bias[0:1, :H]                   # (1, H)
    b2 = bias[1:2, :D_out]               # (1, D_out)

    # First matmul in f32 (K = D_in is tiny; MXU cost negligible, keeps f32 parity).
    h = jnp.dot(x_ref[...], w1_ref[...],
                preferred_element_type=jnp.float32)          # [TB, H] f32
    # Epilogue on the VPU: bias broadcast + ReLU.
    h = jnp.maximum(h + b1, 0.0)
    # Second matmul: quantize activation to bf16 in-kernel, f32 accumulation.
    o = jnp.dot(h.astype(w2_ref.dtype), w2_ref[...],
                preferred_element_type=jnp.float32)          # [TB, D_out] f32
    o_ref[...] = (o + b2).astype(o_ref.dtype)


def prepare_params(w1, b1, w2, b2):
    """One-time parameter prep.  Call once and reuse across forward calls.

    w1: [D_in, H]   (stored [in, out]; matches PyTorch x @ W.T + b)
    b1: [H] or [1, H]
    w2: [H, D_out]
    b2: [D_out] or [1, D_out]
    """
    H = w1.shape[1]
    D_out = w2.shape[1]
    W = max(H, D_out)

    w1_f32 = w1.astype(jnp.float32)
    w2_bf16 = w2.astype(jnp.bfloat16)
    bias = jnp.zeros((2, W), jnp.float32)
    bias = bias.at[0, :H].set(b1.reshape(-1).astype(jnp.float32))
    bias = bias.at[1, :D_out].set(b2.reshape(-1).astype(jnp.float32))
    return w1_f32, w2_bf16, bias


@functools.partial(jax.jit, static_argnames=("max_tile_b",))
def agcn_feature_extract(x, w1_f32, w2_bf16, bias, *, max_tile_b=2048):
    """Equivalent of AGCNNet.forward -> {'features': feature_extract(x)}.

    x: [B, D_in] f32; params from `prepare_params`.  Returns [B, D_out] f32.
    """
    B, D_in = x.shape
    H = w1_f32.shape[1]
    D_out = w2_bf16.shape[1]
    W = bias.shape[1]

    # Balanced, 16-aligned batch tiles; force >= 2 grid steps when the batch is
    # large enough that splitting still fills the MXU (v7x: 2 TensorCores).
    n_tiles = max(_cdiv(B, max_tile_b), 1)
    if B >= 512:
        n_tiles = max(n_tiles, 2)
    tile_b = _round_up(_cdiv(B, n_tiles), 16)
    B_pad = _round_up(B, tile_b)
    grid = (B_pad // tile_b,)

    x_p = x if B_pad == B else jnp.pad(x, ((0, B_pad - B), (0, 0)))

    flops = 2 * B_pad * (D_in * H + H * D_out)
    bytes_accessed = (x_p.size * 4 + w1_f32.size * 4 + w2_bf16.size * 2
                      + bias.size * 4 + B_pad * D_out * 4)
    cost = pl.CostEstimate(flops=flops, transcendentals=0,
                           bytes_accessed=bytes_accessed)

    out = pl.pallas_call(
        _fused_mlp_kernel,
        out_shape=jax.ShapeDtypeStruct((B_pad, D_out), jnp.float32),
        grid_spec=pltpu.PrefetchScalarGridSpec(
            num_scalar_prefetch=0,
            grid=grid,
            in_specs=[
                pl.BlockSpec((tile_b, D_in), lambda i: (i, 0)),  # x tile (f32)
                pl.BlockSpec((D_in, H), lambda i: (0, 0)),       # W1 (resident, f32)
                pl.BlockSpec((H, D_out), lambda i: (0, 0)),      # W2 (resident, bf16)
                pl.BlockSpec((2, W), lambda i: (0, 0)),          # packed biases (f32)
            ],
            out_specs=pl.BlockSpec((tile_b, D_out), lambda i: (i, 0)),
        ),
        compiler_params=pltpu.CompilerParams(
            dimension_semantics=("parallel",),
            vmem_limit_bytes=32 << 20,
        ),
        cost_estimate=cost,
    )(x_p, w1_f32, w2_bf16, bias)

    # Padded rows (if any) contain relu(b1)@W2 + b2 garbage; slice them off.
    return out if B_pad == B else out[:B]


def _init_linear(key, fan_in, fan_out):
    # Deterministic init mimicking PyTorch's default U(-1/sqrt(fan_in), +...).
    kw, kb = jax.random.split(key)
    bound = 1.0 / jnp.sqrt(jnp.float32(fan_in))
    w = jax.random.uniform(kw, (fan_in, fan_out), jnp.float32, -bound, bound)
    b = jax.random.uniform(kb, (fan_out,), jnp.float32, -bound, bound)
    return w, b


if __name__ == "__main__":
    key = jax.random.PRNGKey(0)
    k_x, k_l1, k_l2 = jax.random.split(key, 3)

    # Small shapes consistent with the module: args['input_size'] = 32.
    B, D_IN, HID, D_OUT = 16, 32, 512, 64

    x = jax.random.normal(k_x, (B, D_IN), jnp.float32)
    w1, b1 = _init_linear(k_l1, D_IN, HID)    # Linear(input_size, 512)
    w2, b2 = _init_linear(k_l2, HID, D_OUT)   # Linear(512, 64)

    # One-time parameter prep (reused across calls in inference).
    w1_f32, w2_bf16, bias = prepare_params(w1, b1, w2, b2)

    features = agcn_feature_extract(x, w1_f32, w2_bf16, bias)
    features = jax.block_until_ready(features)

    # Reference with matching numerics: f32 first matmul, bf16 second matmul
    # with f32 accumulation.
    h_ref = jnp.maximum(
        jnp.dot(x, w1, preferred_element_type=jnp.float32) + b1[None, :], 0.0)
    ref = jnp.dot(h_ref.astype(jnp.bfloat16), w2.astype(jnp.bfloat16),
                  preferred_element_type=jnp.float32) + b2[None, :]

    assert features.shape == (B, D_OUT)
    assert jnp.allclose(features, ref, atol=2e-2, rtol=2e-2), float(
        jnp.max(jnp.abs(features - ref)))

    out = {"features": features}  # matches the module's return dict
    print("KERNEL_OK")
</pallas_src>

<mosaic_0001>
module attributes {stable_mosaic.version = 11 : i64} {
  func.func @_fused_mlp_kernel(%arg0: i32, %arg1: memref<16x32xf32, #tpu.memory_space<vmem>>, %arg2: memref<32x512xf32, #tpu.memory_space<vmem>>, %arg3: memref<512x64xbf16, #tpu.memory_space<vmem>>, %arg4: memref<2x512xf32, #tpu.memory_space<vmem>>, %arg5: memref<16x64xf32, #tpu.memory_space<vmem>>) attributes {dimension_semantics = [#tpu.dimension_semantics<parallel>], iteration_bounds = array<i64: 1>, scalar_prefetch = 0 : i64, scratch_operands = 0 : i64, tpu.core_type = #tpu.core_type<tc>, window_params = [{transform_indices = @transform_0, window_bounds = array<i64: 16, 32>}, {pipeline_mode = #tpu.pipeline_mode<synchronous>, transform_indices = @transform_1, window_bounds = array<i64: 32, 512>}, {pipeline_mode = #tpu.pipeline_mode<synchronous>, transform_indices = @transform_2, window_bounds = array<i64: 512, 64>}, {pipeline_mode = #tpu.pipeline_mode<synchronous>, transform_indices = @transform_3, window_bounds = array<i64: 2, 512>}, {transform_indices = @transform_4, window_bounds = array<i64: 16, 64>}]} {
    %c0 = arith.constant 0 : index
    %c0_0 = arith.constant 0 : index
    %0 = vector.load %arg4[%c0, %c0_0] : memref<2x512xf32, #tpu.memory_space<vmem>>, vector<2x512xf32>
    %1 = vector.extract_strided_slice %0 {offsets = [0, 0], sizes = [1, 512], strides = [1, 1]} : vector<2x512xf32> to vector<1x512xf32>
    %2 = vector.extract_strided_slice %0 {offsets = [1, 0], sizes = [1, 64], strides = [1, 1]} : vector<2x512xf32> to vector<1x64xf32>
    %c0_1 = arith.constant 0 : index
    %c0_2 = arith.constant 0 : index
    %3 = vector.load %arg1[%c0_1, %c0_2] : memref<16x32xf32, #tpu.memory_space<vmem>>, vector<16x32xf32>
    %c0_3 = arith.constant 0 : index
    %c0_4 = arith.constant 0 : index
    %4 = vector.load %arg2[%c0_3, %c0_4] : memref<32x512xf32, #tpu.memory_space<vmem>>, vector<32x512xf32>
    %cst = arith.constant dense<0.000000e+00> : vector<16x512xf32>
    %5 = tpu.matmul %3, %4, %cst {dimension_numbers = #tpu.dot_dimension_numbers<[1], [0], [0], [1], [0, 0, 1, 1], [], []>} : vector<16x32xf32>, vector<32x512xf32>, vector<16x512xf32> -> vector<16x512xf32>
    %6 = vector.broadcast %1 : vector<1x512xf32> to vector<16x512xf32>
    %7 = arith.addf %5, %6 : vector<16x512xf32>
    %cst_5 = arith.constant 0.000000e+00 : f32
    %8 = vector.broadcast %cst_5 : f32 to vector<16x512xf32>
    %9 = arith.maximumf %7, %8 : vector<16x512xf32>
    %10 = arith.truncf %9 : vector<16x512xf32> to vector<16x512xbf16>
    %c0_6 = arith.constant 0 : index
    %c0_7 = arith.constant 0 : index
    %11 = vector.load %arg3[%c0_6, %c0_7] : memref<512x64xbf16, #tpu.memory_space<vmem>>, vector<512x64xbf16>
    %cst_8 = arith.constant dense<0.000000e+00> : vector<16x64xf32>
    %12 = tpu.matmul %10, %11, %cst_8 {dimension_numbers = #tpu.dot_dimension_numbers<[1], [0], [0], [1], [0, 0, 1, 1], [], []>} : vector<16x512xbf16>, vector<512x64xbf16>, vector<16x64xf32> -> vector<16x64xf32>
    %13 = vector.broadcast %2 : vector<1x64xf32> to vector<16x64xf32>
    %14 = arith.addf %12, %13 : vector<16x64xf32>
    %c0_9 = arith.constant 0 : index
    %c0_10 = arith.constant 0 : index
    %15 = vector.load %arg5[%c0_9, %c0_10] : memref<16x64xf32, #tpu.memory_space<vmem>>, vector<16x64xf32>
    tpu.vector_store %arg5[%c0_9, %c0_10], %14 {strides = array<i32>} : memref<16x64xf32, #tpu.memory_space<vmem>>, vector<16x64xf32>,
    return
  }
  func.func @transform_0(%arg0: i32) -> (i32, i32) {
    %c0_i32 = arith.constant 0 : i32
    %c0_i32_0 = arith.constant 0 : i32
    return %arg0, %c0_i32 : i32, i32
  }
  func.func @transform_1(%arg0: i32) -> (i32, i32) {
    %c0_i32 = arith.constant 0 : i32
    %c0_i32_0 = arith.constant 0 : i32
    %c0_i32_1 = arith.constant 0 : i32
    return %c0_i32, %c0_i32_0 : i32, i32
  }
  func.func @transform_2(%arg0: i32) -> (i32, i32) {
    %c0_i32 = arith.constant 0 : i32
    %c0_i32_0 = arith.constant 0 : i32
    %c0_i32_1 = arith.constant 0 : i32
    return %c0_i32, %c0_i32_0 : i32, i32
  }
  func.func @transform_3(%arg0: i32) -> (i32, i32) {
    %c0_i32 = arith.constant 0 : i32
    %c0_i32_0 = arith.constant 0 : i32
    %c0_i32_1 = arith.constant 0 : i32
    return %c0_i32, %c0_i32_0 : i32, i32
  }
  func.func @transform_4(%arg0: i32) -> (i32, i32) {
    %c0_i32 = arith.constant 0 : i32
    %c0_i32_0 = arith.constant 0 : i32
    return %arg0, %c0_i32 : i32, i32
  }
}

</mosaic_0001>

<bundles_post_ra>
// kernel: agcn_feature_extract.1
= control target key start
LH: loop header
LB: loop body
LE: loop exit
PB: predicated region body
PF: predicated region fallthrough
CT: control target
= control target key end

     0   :  { %v765_v7 = vmov 0.0   ;;  %vm75_vm0 = vcmask 261120   ;;  %s963_s0 = inlined_call_operand.vmem [shape: f32[16,32], index: 0, kind: input, shape index: {}]   ;;  %s964_s1 = inlined_call_operand.vmem [shape: f32[32,512], index: 1, kind: input, shape index: {}]   ;;  %s965_s2 = inlined_call_operand.vmem [shape: bf16[512,64], index: 2, kind: input, shape index: {}]   ;;  %s966_s3 = inlined_call_operand.vmem [shape: f32[2,512], index: 3, kind: input, shape index: {}]   ;;  %s967_s4 = inlined_call_operand.hbm [shape: f32[16,64], index: 4, kind: output, shape index: {}]  }
   0x1   :  { %v23_v0 = vld [vmem:[%s964_s1 + $0x8] sm:$0xff]  ;;  %v25_v2 = vld [vmem:[%s964_s1 + $0x18] sm:$0xff]  ;;  %v22_v5 = vld [vmem:[%s964_s1] sm:$0xff]  ;;  %146 = vmatprep.mubr.f32.mxu0 %v765_v7  ;;  %223 = vmatprep.mubr.f32.mxu1 %v765_v7 }
   0x2   :  { %v27_v1 = vld [vmem:[%s964_s1 + $0x28] sm:$0xff]  ;;  %v29_v4 = vld [vmem:[%s964_s1 + $0x38] sm:$0xff]  ;;  %v26_v6 = vld [vmem:[%s964_s1 + $0x20] sm:$0xff] }
   0x3   :  { %v689_v3 = vpack.c.bf16 %v27_v1, %v23_v0  ;;  %v697_v8 = vpack.c.bf16 %v29_v4, %v25_v2  ;;  %v691_v9 = vpack.c.bf16 %v26_v6, %v22_v5  ;;  %v24_v10 = vld [vmem:[%s964_s1 + $0x10] sm:$0xff]  ;;  %v31_v12 = vld [vmem:[%s964_s1 + $0x48] sm:$0xff]  ;;  %v33_v15 = vld [vmem:[%s964_s1 + $0x58] sm:$0xff] }
   0x4   :  { %v28_v11 = vld [vmem:[%s964_s1 + $0x30] sm:$0xff]  ;;  %v35_v14 = vld [vmem:[%s964_s1 + $0x68] sm:$0xff]  ;;  %v37_v16 = vld [vmem:[%s964_s1 + $0x78] sm:$0xff] }
   0x5   :  { %690 = vmatprep.subr.bf16.mxu0 %v689_v3  ;;  %v699_v13 = vpack.c.bf16 %v28_v11, %v24_v10  ;;  %698 = vmatprep.subr.bf16.mxu1 %v697_v8  ;;  %v693_v17 = vpack.c.bf16 %v35_v14, %v31_v12  ;;  %v701_v18 = vpack.c.bf16 %v37_v16, %v33_v15  ;;  %v30_v19 = vld [vmem:[%s964_s1 + $0x40] sm:$0xff]  ;;  %v32_v21 = vld [vmem:[%s964_s1 + $0x50] sm:$0xff]  ;;  %v21_v30 = vld [vmem:[%s963_s0 + $0x8] sm:$0xff] }
   0x6   :  { %692 = vmatpush1.bf16.msra.mxu0 %v691_v9  ;;  %v34_v20 = vld [vmem:[%s964_s1 + $0x60] sm:$0xff]  ;;  %v36_v23 = vld [vmem:[%s964_s1 + $0x70] sm:$0xff]  ;;  %v713_v31 = vld [vmem:[%s965_s2 + $0x48] sm:$0xff]  }
   0x7   :  { %700 = vmatpush1.bf16.msra.mxu1 %v699_v13  ;;  %v695_v22 = vpack.c.bf16 %v34_v20, %v30_v19  ;;  %694 = vmatprep.subr.bf16.mxu0 %v693_v17  ;;  %v703_v24 = vpack.c.bf16 %v36_v23, %v32_v21  ;;  %v20_v25 = vld [vmem:[%s963_s0] sm:$0xff]  ;;  %v714_v32 = vld [vmem:[%s965_s2 + $0xc8] sm:$0xff]   ;;  %v717_v35 = vld [vmem:[%s965_s2 + $0x50] sm:$0xff]  }
   0x8   :  { %702 = vmatprep.subr.bf16.mxu1 %v701_v18  ;;  %v709_v26 = vld [vmem:[%s965_s2 + $0x40] sm:$0xff]   ;;  %v715_v33 = vld [vmem:[%s965_s2 + $0x8] sm:$0xff]   ;;  %v718_v36 = vld [vmem:[%s965_s2 + $0xd0] sm:$0xff]  }
   0x9   :  { %v710_v27 = vld [vmem:[%s965_s2 + $0xc0] sm:$0xff]   ;;  %v716_v34 = vld [vmem:[%s965_s2 + $0x88] sm:$0xff]   ;;  %v719_v37 = vld [vmem:[%s965_s2 + $0x10] sm:$0xff]  }
   0xa   :  { %696 = vmatpush1.bf16.msra.mxu0 %v695_v22  ;;  %v711_v28 = vld [vmem:[%s965_s2] sm:$0xff]   ;;  %v720_v38 = vld [vmem:[%s965_s2 + $0x90] sm:$0xff]   ;;  %v721_v39 = vld [vmem:[%s965_s2 + $0x58] sm:$0xff]  }
   0xb   :  { %704 = vmatpush1.bf16.msra.mxu1 %v703_v24  ;;  %645 = vmatprep.subr.bf16.mxu0 %v709_v26  ;;  %v712_v29 = vld [vmem:[%s965_s2 + $0x80] sm:$0xff]   ;;  %v722_v40 = vld [vmem:[%s965_s2 + $0xd8] sm:$0xff]  }
   0xc   :  { %667 = vmatprep.subr.bf16.mxu1 %v710_v27  ;;  %v723_v41 = vld [vmem:[%s965_s2 + $0x18] sm:$0xff]   ;;  %v725_v43 = vld [vmem:[%s965_s2 + $0x60] sm:$0xff]  }
   0xd   :  { %609 = vmatmul.mubr.msk.f32.vlgmr.msra.gmra.mrb[0].mxu0 %vm75_vm0, %v20_v25  ;;  %v724_v42 = vld [vmem:[%s965_s2 + $0x98] sm:$0xff]   ;;  %v726_v44 = vld [vmem:[%s965_s2 + $0xe0] sm:$0xff]  }
   0xe   :  { %611 = vmatmul.mubr.msk.f32.vlgmr.msra.gmra.mrb[0].mxu1 %vm75_vm0, %v20_v25  ;;  %152 = vmatprep.mubr.f32.mxu0 %v765_v7  ;;  %v727_v45 = vld [vmem:[%s965_s2 + $0x20] sm:$0xff]  }
   0xf   :  { %229 = vmatprep.mubr.f32.mxu1 %v765_v7  ;;  %646 = vmatpush3.bf16.msra.mxu0 %v711_v28  ;;  %v728_v46 = vld [vmem:[%s965_s2 + $0xa0] sm:$0xff]  }
  0x10   :  { %668 = vmatpush3.bf16.msra.mxu1 %v712_v29  ;;  %647 = vmatprep.subr.bf16.mxu0 %v713_v31 }
  0x11   :  { %610 = vmatmul.mubr.msk.f32.gmra.mrb[2].mxu0 %vm75_vm0, %v21_v30  ;;  %669 = vmatprep.subr.bf16.mxu1 %v714_v32 }
  0x12   :  { %612 = vmatmul.mubr.msk.f32.gmra.mrb[2].mxu1 %vm75_vm0, %v21_v30 }
  0x13   :  { %648 = vmatpush3.bf16.msra.mxu0 %v715_v33 }
  0x14   :  { %670 = vmatpush3.bf16.msra.mxu1 %v716_v34  ;;  %649 = vmatprep.subr.bf16.mxu0 %v717_v35 }
  0x15   :  { %671 = vmatprep.subr.bf16.mxu1 %v718_v36 }
  0x17   :  { %650 = vmatpush3.bf16.msra.mxu0 %v719_v37 }
  0x18   :  { %672 = vmatpush3.bf16.msra.mxu1 %v720_v38  ;;  %651 = vmatprep.subr.bf16.mxu0 %v721_v39 }
  0x19   :  { %673 = vmatprep.subr.bf16.mxu1 %v722_v40 }
  0x1b   :  { %652 = vmatpush3.bf16.msra.mxu0 %v723_v41 }
  0x1c   :  { %674 = vmatpush3.bf16.msra.mxu1 %v724_v42  ;;  %653 = vmatprep.subr.bf16.mxu0 %v725_v43 }
  0x1d   :  { %675 = vmatprep.subr.bf16.mxu1 %v726_v44 }
  0x1f   :  { %654 = vmatpush3.bf16.msra.mxu0 %v727_v45 }
  0x20   :  { %676 = vmatpush3.bf16.msra.mxu1 %v728_v46 }
  0x21   :  { %9 = vsyncpa [#allocation3], 0  ;;  %v729_v47 = vld [vmem:[%s965_s2 + $0x68] sm:$0xff]   ;;  %v733_v51 = vld [vmem:[%s965_s2 + $0x70] sm:$0xff]   ;;  %v39_v59 = vlaneseq  ;;  %vm590_vm1 = vcmask 523264  }
  0x22   :  { %v730_v48 = vld [vmem:[%s965_s2 + $0xe8] sm:$0xff]   ;;  %655 = vmatprep.subr.bf16.mxu0 %v729_v47  ;;  %v734_v52 = vld [vmem:[%s965_s2 + $0xf0] sm:$0xff]   ;;  %v737_v55 = vld [vmem:[%s965_s2 + $0x78] sm:$0xff]  }
  0x23   :  { %v731_v49 = vld [vmem:[%s965_s2 + $0x28] sm:$0xff]   ;;  %677 = vmatprep.subr.bf16.mxu1 %v730_v48  ;;  %v735_v53 = vld [vmem:[%s965_s2 + $0x30] sm:$0xff]   ;;  %v738_v56 = vld [vmem:[%s965_s2 + $0xf8] sm:$0xff]   ;;  %v40_v60 = vshrl.u32 %v39_v59, 7 }
  0x24   :  { %v732_v50 = vld [vmem:[%s965_s2 + $0xa8] sm:$0xff]   ;;  %656 = vmatpush3.bf16.msra.mxu0 %v731_v49  ;;  %v736_v54 = vld [vmem:[%s965_s2 + $0xb0] sm:$0xff]   ;;  %v739_v57 = vld [vmem:[%s965_s2 + $0x38] sm:$0xff]  }
  0x25   :  { %678 = vmatpush3.bf16.msra.mxu1 %v732_v50  ;;  %657 = vmatprep.subr.bf16.mxu0 %v733_v51  ;;  %v740_v58 = vld [vmem:[%s965_s2 + $0xb8] sm:$0xff]   ;;  %v41_v61 = vsub.s32 0, %v40_v60  ;;  %v19_v62 = vld [vmem:[%s966_s3] sm:$0xff]  ;;  %v45_v63 = vsub.s32 2, %v40_v60  ;;  %v49_v0 = vsub.s32 4, %v40_v60  ;;  %v53_v1 = vsub.s32 6, %v40_v60 }
  0x26   :  { %679 = vmatprep.subr.bf16.mxu1 %v734_v52  ;;  %v314_v38 = vsub.s32 1, %v40_v60  ;;  %s766_s2 = smov [#allocation2]  }
  0x27   :  { %v42_v2 = vrot.slane %v19_v62, %v41_v61  ;;  %v46_v3 = vrot.slane %v19_v62, %v45_v63  ;;  %v50_v4 = vrot.slane %v19_v62, %v49_v0  ;;  %v54_v5 = vrot.slane %v19_v62, %v53_v1  ;;  %s598_s3 = sshll.u32 %s766_s2, 4  ;;  %s599_s3 = int_to_ptr.vmem [resolvable:$true] %s598_s3 }
  0x28   :  { %658 = vmatpush3.bf16.msra.mxu0 %v735_v53  ;;  %v315_v40 = vrot.slane %v19_v62, %v314_v38  ;;  %s741_s8 = scalar_lea.vmem %s599_s3, 256  ;;  %p746_p1 = scmp.lt.s32.totalorder %s599_s3, %s599_s3 }
  0x29   :  { %680 = vmatpush3.bf16.msra.mxu1 %v736_v54  ;;  %659 = vmatprep.subr.bf16.mxu0 %v737_v55  ;;  %v62_v6 = vrot.slane %v42_v2, %v41_v61  ;;  %v66_v8 = vrot.slane %v46_v3, %v41_v61  ;;  %v70_v9 = vrot.slane %v50_v4, %v41_v61  ;;  %p742_p0 = scmp.ne.s32.totalorder %s599_s3, %s741_s8  ;;  %p747_p2 = scmp.lt.s32.totalorder %s741_s8, %s741_s8 }
  0x2a   :  { %681 = vmatprep.subr.bf16.mxu1 %v738_v56  ;;  %v74_v12 = vrot.slane %v54_v5, %v41_v61 }
  0x2b   :  { %p748_p3 = por %p747_p2, %p746_p1 }
  0x2c   :  { %660 = vmatpush3.bf16.msra.mxu0 %v739_v57 }
  0x2d   :  { %682 = vmatpush3.bf16.msra.mxu1 %v740_v58  ;;  %p749_p4 = pnand %p748_p3, %p742_p0 }
  0xe0   :  { %v148_v7 = vpop.f32.mrb[0].mxu0 }
  0xe1   :  { %v150_v10 = vpop.f32.mrb[1].mxu0  ;;  %v225_v11 = vpop.f32.mrb[0].mxu1  ;;  %v149_v14 = vadd.f32 %v148_v7, %v62_v6 }
  0xe2   :  { %v227_v13 = vpop.f32.mrb[1].mxu1  ;;  %v151_v15 = vadd.f32 %v150_v10, %v66_v8  ;;  %v226_v16 = vadd.f32 %v225_v11, %v70_v9 }
  0xe3   :  { %v228_v18 = vadd.f32 %v227_v13, %v74_v12  ;;  %v236_v25 = vmax.f32 %v149_v14, 0.0 }
  0xe4   :  { %v154_v17 = vpop.f32.mrb[2].mxu0  ;;  %v237_v28 = vmax.f32 %v151_v15, 0.0  ;;  %v238_v29 = vmax.f32 %v226_v16, 0.0 }
  0xe5   :  { %v155_v19 = vadd.f32 %v154_v17, %v62_v6  ;;  %v231_v20 = vpop.f32.mrb[2].mxu1  ;;  %v156_v21 = vpop.f32.mrb[3].mxu0  ;;  %v239_v32 = vmax.f32 %v228_v18, 0.0 }
  0xe6   :  { %v232_v22 = vadd.f32 %v231_v20, %v70_v9  ;;  %v157_v23 = vadd.f32 %v156_v21, %v66_v8  ;;  %v233_v24 = vpop.f32.mrb[3].mxu1 }
  0xe7   :  { %v240_v26 = vmax.f32 %v155_v19, 0.0  ;;  %v234_v27 = vadd.f32 %v233_v24, %v74_v12 }
  0xe8   :  { %v242_v30 = vmax.f32 %v232_v22, 0.0  ;;  %v241_v31 = vmax.f32 %v157_v23, 0.0 }
  0xe9   :  { %v244_v33 = vpack.c.bf16 %v240_v26, %v236_v25  ;;  %v243_v34 = vmax.f32 %v234_v27, 0.0 }
  0xea   :  { %v246_v35 = vpack.c.bf16 %v242_v30, %v238_v29  ;;  %v245_v36 = vpack.c.bf16 %v241_v31, %v237_v28 }
  0xeb   :  { %v247_v37 = vpack.c.bf16 %v243_v34, %v239_v32 }
  0xec   :  { %540 = vmatprep.mubr.bf16.mxu0 %v245_v36 }
  0xed   :  { %581 = vmatprep.mubr.bf16.mxu1 %v247_v37  ;;  %541 = vmatmul.mubr.bf16.vlgmr.msra.gmra.mrb[4].mxu0 %v244_v33 }
  0xee   :  { %582 = vmatmul.mubr.bf16.vlgmr.msra.gmra.mrb[4].mxu1 %v246_v35 }
 0x1c0   :  { %v661_v39 = vpop.f32.mrb[4].mxu0 }
 0x1c1   :  { %v683_v41 = vpop.f32.mrb[4].mxu1  ;;  %v662_v42 = vpop.f32.mrb[5].mxu0 }
 0x1c2   :  { %v663_v43 = vadd.f32 %v662_v42, %v661_v39  ;;  %v684_v44 = vpop.f32.mrb[5].mxu1  ;;  %v664_v45 = vpop.f32.mrb[6].mxu0 }
 0x1c3   :  { %v685_v46 = vadd.f32 %v684_v44, %v683_v41  ;;  %v686_v47 = vpop.f32.mrb[6].mxu1  ;;  %v665_v48 = vpop.f32.mrb[7].mxu0 }
 0x1c4   :  { %v543_v49 = vadd.f32 %v663_v43, %v315_v40  ;;  %v666_v50 = vadd.f32 %v665_v48, %v664_v45  ;;  %v687_v51 = vpop.f32.mrb[7].mxu1 }
 0x1c5   :  { %v688_v52 = vadd.f32 %v687_v51, %v686_v47 }
 0x1c6   :  { %v584_v53 = vadd.f32 %v685_v46, %v543_v49  ;;  %v546_v54 = vadd.f32 %v666_v50, %v315_v40 }
 0x1c8   :  { %591 = vst.msk [vmem:[#allocation2] sm:$0xff] %vm590_vm1, %v584_v53  ;;  %v587_v55 = vadd.f32 %v688_v52, %v546_v54 }
 0x1ca   :  { %592 = vst.msk [vmem:[#allocation2 + $0x8] sm:$0xff] %vm590_vm1, %v587_v55 }
 0x1cb   :  { %752 = shalt.err (!%p749_p4)
}
 0x1cc   :  { %s753_s11 = scalar_lea.hbm %s967_s4, 256 }
 0x1cd   :  { %p754_p5 = scmp.ne.s32.totalorder %s967_s4, %s753_s11  ;;  %p757_p6 = scmp.lt.u32.totalorder %s753_s11, %s967_s4 }
 0x1cf   :  { %p759_p7 = pnand %p757_p6, %p754_p5 }
 0x1d1   :  { %762 = shalt.err (!%p759_p7)
}
 0x1d2   :  { %s767_s15 = smov 128   ;;  %s768_s16 = smov 8  }
 0x1d3   :  { %604 = dma.vmem_to_hbm [thread:$0]  %s599_s3, 256, %s967_s4, [#allocation3], %s767_s15, %s767_s15, %s768_s16  }
 0x1d4   :  { %763 = dma.done.wait [#allocation3], 256  }
 0x1d5   :  { %764 = vsyncadd [#allocation3], 4294967040 }
 0x1d6   :  { %608 = vsyncpa [#allocation3], 1 }

</bundles_post_ra>
